<compile_context>
chip_gen: v6e
topology: v6e:2x2x1
jax: 0.10.0
libtpu: 0.0.40
codegen_flags: <defaults>
</compile_context>

<pallas_src>
import jax
import jax.numpy as jnp
from jax.experimental import pallas as pl
from jax.experimental.pallas import tpu as pltpu

BN_EPS = 1e-5


def _round_up(n, m):
    return int(pl.cdiv(n, m)) * m


def _bn_relu_kernel(x_ref, gamma_ref, beta_ref, y_ref):
    """BatchNorm1d (training mode, batch stats) + ReLU on one feature slab."""
    x = x_ref[...].astype(jnp.float32)                       # (B, TD)
    mean = jnp.mean(x, axis=0, keepdims=True)                # (1, TD)
    var = jnp.mean((x - mean) ** 2, axis=0, keepdims=True)   # biased variance
    a = gamma_ref[...] * jax.lax.rsqrt(var + BN_EPS)         # (1, TD)
    b = beta_ref[...] - mean * a                             # (1, TD)
    y_ref[...] = jnp.maximum(x * a + b, 0.0).astype(y_ref.dtype)


def _linear_kernel(y_ref, w_ref, b_ref, out_ref):
    """One class tile: out = y @ W_tile.T + bias_tile (fp32 accumulation)."""
    # y: (B, D), w: (TN, D)  -> contract last dims, no transpose needed.
    out = jax.lax.dot_general(
        y_ref[...], w_ref[...],
        dimension_numbers=(((1,), (1,)), ((), ())),
        preferred_element_type=jnp.float32)                  # (B, TN)
    out_ref[...] = (out + b_ref[...]).astype(out_ref.dtype)


def insightface_classifier(x, gamma, beta, weight, bias, *,
                           matmul_dtype=jnp.bfloat16, tn_cap=2048):
    """x: (B, 512); weight: (num_classes, 512) PyTorch layout; bias: (num_classes,)."""
    B, D = x.shape
    C = weight.shape[0]
    assert weight.shape == (C, D) and bias.shape == (C,)

    # ---------------- Stage 1: fused BatchNorm1d + ReLU (once per batch) ----
    gamma2 = gamma.reshape(1, D).astype(jnp.float32)
    beta2 = beta.reshape(1, D).astype(jnp.float32)
    TD = 128 if D % 128 == 0 else D            # lane-dense feature slab
    y = pl.pallas_call(
        _bn_relu_kernel,
        out_shape=jax.ShapeDtypeStruct((B, D), matmul_dtype),
        grid=(D // TD,),
        in_specs=[
            pl.BlockSpec((B, TD), lambda j: (0, j)),
            pl.BlockSpec((1, TD), lambda j: (0, j)),
            pl.BlockSpec((1, TD), lambda j: (0, j)),
        ],
        out_specs=pl.BlockSpec((B, TD), lambda j: (0, j)),
        compiler_params=pltpu.CompilerParams(
            dimension_semantics=("parallel",)),
    )(x, gamma2, beta2)

    # ---------------- Stage 2: class-tiled weight-streaming Linear ----------
    TN = min(_round_up(C, 128), _round_up(tn_cap, 128))   # lane-dense tile
    C_pad = _round_up(C, TN)                              # pad classes to tile
    # NOTE: for a real deployment, store the weight persistently in
    # `matmul_dtype` (e.g. bf16) so this cast is not paid per call.
    w = weight.astype(matmul_dtype)
    bias_p = bias.astype(jnp.float32)
    if C_pad != C:
        w = jnp.pad(w, ((0, C_pad - C), (0, 0)))
        bias_p = jnp.pad(bias_p, (0, C_pad - C))
    bias2 = bias_p.reshape(1, C_pad)

    n_tiles = C_pad // TN
    itemsize = jnp.dtype(matmul_dtype).itemsize
    vmem_needed = (2 * TN * D * itemsize      # double-buffered weight tiles
                   + 2 * B * TN * 4           # double-buffered fp32 out tiles
                   + B * D * itemsize         # resident activations
                   + 2 * TN * 4)              # bias tiles
    vmem_limit = int(min(max(32 << 20, 2 * vmem_needed), 64 << 20))

    out = pl.pallas_call(
        _linear_kernel,
        out_shape=jax.ShapeDtypeStruct((B, C_pad), jnp.float32),
        grid=(n_tiles,),
        in_specs=[
            pl.BlockSpec((B, D), lambda j: (0, 0)),    # activations, reused
            pl.BlockSpec((TN, D), lambda j: (j, 0)),   # streamed weight tile
            pl.BlockSpec((1, TN), lambda j: (0, j)),   # bias tile
        ],
        out_specs=pl.BlockSpec((B, TN), lambda j: (0, j)),
        compiler_params=pltpu.CompilerParams(
            dimension_semantics=("parallel",),         # shard class tiles (v7x 2 TCs)
            vmem_limit_bytes=vmem_limit),
    )(y, w, bias2)

    return out[:, :C]


def _reference(x, gamma, beta, weight, bias):
    mean = jnp.mean(x, axis=0, keepdims=True)
    var = jnp.mean((x - mean) ** 2, axis=0, keepdims=True)
    y = (x - mean) / jnp.sqrt(var + BN_EPS) * gamma + beta
    y = jnp.maximum(y, 0.0)
    return y @ weight.T + bias


if __name__ == "__main__":
    B, D, NUM_CLASSES = 8, 512, 16

    key = jax.random.PRNGKey(0)
    kx, kw, kb = jax.random.split(key, 3)

    x = jax.random.normal(kx, (B, D), dtype=jnp.float32)

    # Deterministic parameter init matching the module's __init__ shapes.
    gamma = jnp.ones((D,), dtype=jnp.float32)          # BN weight init
    beta = jnp.zeros((D,), dtype=jnp.float32)          # BN bias init
    bound = 1.0 / (D ** 0.5)
    weight = jax.random.uniform(kw, (NUM_CLASSES, D), minval=-bound, maxval=bound,
                                dtype=jnp.float32)     # Linear weight (C, 512)
    bias = jax.random.uniform(kb, (NUM_CLASSES,), minval=-bound, maxval=bound,
                              dtype=jnp.float32)

    ref = _reference(x, gamma, beta, weight, bias)

    # Exact-semantics path: fp32 weight stream, strict tolerance vs reference.
    out_fp32 = jax.block_until_ready(
        insightface_classifier(x, gamma, beta, weight, bias,
                               matmul_dtype=jnp.float32))
    assert out_fp32.shape == (B, NUM_CLASSES)
    assert jnp.allclose(out_fp32, ref, atol=1e-4, rtol=1e-4)

    # Default fast path: bf16 weight/activation stream, fp32 MXU accumulation.
    out_bf16 = jax.block_until_ready(
        insightface_classifier(x, gamma, beta, weight, bias))
    assert out_bf16.shape == (B, NUM_CLASSES)
    assert jnp.allclose(out_bf16, ref, atol=3e-2, rtol=3e-2)

    print("KERNEL_OK")
</pallas_src>

<mosaic_0001>
module attributes {stable_mosaic.version = 11 : i64} {
  func.func @_bn_relu_kernel(%arg0: i32, %arg1: memref<8x128xf32, #tpu.memory_space<vmem>>, %arg2: memref<1x128xf32, #tpu.memory_space<vmem>>, %arg3: memref<1x128xf32, #tpu.memory_space<vmem>>, %arg4: memref<8x128xf32, #tpu.memory_space<vmem>>) attributes {dimension_semantics = [#tpu.dimension_semantics<parallel>], iteration_bounds = array<i64: 4>, scalar_prefetch = 0 : i64, scratch_operands = 0 : i64, tpu.core_type = #tpu.core_type<tc>, window_params = [{transform_indices = @transform_0, window_bounds = array<i64: 8, 128>}, {transform_indices = @transform_1, window_bounds = array<i64: 1, 128>}, {transform_indices = @transform_2, window_bounds = array<i64: 1, 128>}, {transform_indices = @transform_3, window_bounds = array<i64: 8, 128>}]} {
    %c0 = arith.constant 0 : index
    %c0_0 = arith.constant 0 : index
    %0 = vector.load %arg1[%c0, %c0_0] : memref<8x128xf32, #tpu.memory_space<vmem>>, vector<8x128xf32>
    %cst = arith.constant dense<0.000000e+00> : vector<128xf32>
    %1 = vector.multi_reduction <add>, %0, %cst [0] : vector<8x128xf32> to vector<128xf32>
    %2 = vector.shape_cast %1 : vector<128xf32> to vector<1x128xf32>
    %cst_1 = arith.constant 8.000000e+00 : f32
    %3 = vector.broadcast %cst_1 : f32 to vector<1x128xf32>
    %4 = arith.divf %2, %3 : vector<1x128xf32>
    %5 = vector.broadcast %4 : vector<1x128xf32> to vector<8x128xf32>
    %6 = arith.subf %0, %5 : vector<8x128xf32>
    %7 = arith.mulf %6, %6 : vector<8x128xf32>
    %cst_2 = arith.constant dense<0.000000e+00> : vector<128xf32>
    %8 = vector.multi_reduction <add>, %7, %cst_2 [0] : vector<8x128xf32> to vector<128xf32>
    %9 = vector.shape_cast %8 : vector<128xf32> to vector<1x128xf32>
    %cst_3 = arith.constant 8.000000e+00 : f32
    %10 = vector.broadcast %cst_3 : f32 to vector<1x128xf32>
    %11 = arith.divf %9, %10 : vector<1x128xf32>
    %c0_4 = arith.constant 0 : index
    %c0_5 = arith.constant 0 : index
    %12 = vector.load %arg2[%c0_4, %c0_5] : memref<1x128xf32, #tpu.memory_space<vmem>>, vector<1x128xf32>
    %cst_6 = arith.constant 9.99999974E-6 : f32
    %13 = vector.broadcast %cst_6 : f32 to vector<1x128xf32>
    %14 = arith.addf %11, %13 : vector<1x128xf32>
    %15 = math.rsqrt %14 : vector<1x128xf32>
    %16 = arith.mulf %12, %15 : vector<1x128xf32>
    %c0_7 = arith.constant 0 : index
    %c0_8 = arith.constant 0 : index
    %17 = vector.load %arg3[%c0_7, %c0_8] : memref<1x128xf32, #tpu.memory_space<vmem>>, vector<1x128xf32>
    %18 = arith.mulf %4, %16 : vector<1x128xf32>
    %19 = arith.subf %17, %18 : vector<1x128xf32>
    %20 = vector.broadcast %16 : vector<1x128xf32> to vector<8x128xf32>
    %21 = arith.mulf %0, %20 : vector<8x128xf32>
    %22 = vector.broadcast %19 : vector<1x128xf32> to vector<8x128xf32>
    %23 = arith.addf %21, %22 : vector<8x128xf32>
    %cst_9 = arith.constant 0.000000e+00 : f32
    %24 = vector.broadcast %cst_9 : f32 to vector<8x128xf32>
    %25 = arith.maximumf %23, %24 : vector<8x128xf32>
    %c0_10 = arith.constant 0 : index
    %c0_11 = arith.constant 0 : index
    %26 = vector.load %arg4[%c0_10, %c0_11] : memref<8x128xf32, #tpu.memory_space<vmem>>, vector<8x128xf32>
    tpu.vector_store %arg4[%c0_10, %c0_11], %25 {strides = array<i32>} : memref<8x128xf32, #tpu.memory_space<vmem>>, vector<8x128xf32>,
    return
  }
  func.func @transform_0(%arg0: i32) -> (i32, i32) {
    %c0_i32 = arith.constant 0 : i32
    %c0_i32_0 = arith.constant 0 : i32
    return %c0_i32, %arg0 : i32, i32
  }
  func.func @transform_1(%arg0: i32) -> (i32, i32) {
    %c0_i32 = arith.constant 0 : i32
    %c0_i32_0 = arith.constant 0 : i32
    return %c0_i32, %arg0 : i32, i32
  }
  func.func @transform_2(%arg0: i32) -> (i32, i32) {
    %c0_i32 = arith.constant 0 : i32
    %c0_i32_0 = arith.constant 0 : i32
    return %c0_i32, %arg0 : i32, i32
  }
  func.func @transform_3(%arg0: i32) -> (i32, i32) {
    %c0_i32 = arith.constant 0 : i32
    %c0_i32_0 = arith.constant 0 : i32
    return %c0_i32, %arg0 : i32, i32
  }
}

</mosaic_0001>

<bundles_post_ra>
// kernel: tpu_custom_call.1
= control target key start
LH: loop header
LB: loop body
LE: loop exit
PB: predicated region body
PF: predicated region fallthrough
CT: control target
= control target key end

     0   :  { %s863_s0 = inlined_call_operand.hbm [shape: f32[8,512], index: 0, kind: input, shape index: {}]   ;;  %s864_s1 = inlined_call_operand.hbm [shape: f32[1,512], index: 1, kind: input, shape index: {}]   ;;  %s865_s2 = inlined_call_operand.hbm [shape: f32[1,512], index: 2, kind: input, shape index: {}]   ;;  %s866_s3 = inlined_call_operand.hbm [shape: f32[8,512], index: 3, kind: output, shape index: {}]  }
   0x1   :  { %869 = sst [smem:[#allocation13_spill]] %s864_s1 }
   0x2   :  { %8 = vsyncpa [#allocation3], 0 }
   0x3   :  { %10 = vsyncpa [#allocation3 + $0x1], 0 }
   0x4   :  { %11 = vsyncpa [#allocation6], 0 }
   0x5   :  { %13 = vsyncpa [#allocation6 + $0x1], 0 }
   0x6   :  { %14 = vsyncpa [#allocation4], 0 }
   0x7   :  { %16 = vsyncpa [#allocation4 + $0x1], 0  ;;  %s663_s12 = smov 0   ;;  %s665_s13 = smov 0  }
   0x8   :  { %s667_s14 = smov 0   ;;  %s669_s15 = smov 0  }
   0x9 LB: > { %s684_s16 = sadd.s32 4294967295, %s637_s15   ;;  %s413_s17 = sadd.s32 4294967294, %s637_s15   ;;  %s637_s15 = sphi %s669_s15, %s886_s15   ;;  %s633_s14 = sphi %s667_s14, %s885_s14   ;;  %s629_s13 = sphi %s665_s13, %s884_s13   ;;  %s625_s12 = sphi %s663_s12, %s883_s12  }
   0xa   : > { %s688_s18 = sadd.s32 1, %s637_s15   ;;  %s29_s19 = sadd.s32 1, %s633_s14 }
   0xb   : > { %s26_s20 = ssub.s32 %s637_s15, %s688_s18  ;;  %p36_p0 = scmp.ne.s32.totalorder %s633_s14, %s629_s13 }
   0xc   : > { %p27_p1 = scmp.eq.s32.totalorder %s26_s20, 0  ;;  %p37_p2 = scmp.eq.s32.totalorder %s637_s15, 0 }
   0xd   : > { %p42_p3 = scmp.ne.s32.totalorder %s629_s13, %s625_s12  ;;  %p43_p4 = scmp.eq.s32.totalorder %s684_s16, 0 }
   0xe   : > { %s700_s21 = scalar_select %p27_p1, %s633_s14, %s29_s19  }
   0xf   : > { %p38_p5 = por %p37_p2, %p36_p0  ;;  %p702_p6 = por %p43_p4, %p42_p3 }
  0x10   : > { %870 = sst [smem:[#allocation12_spill]] %s700_s21  ;;  %p118_p7 = scmp.eq.s32.totalorder %s684_s16, 3 }
  0x11   : > { %s871_s22 = scalar_select %p702_p6, 1, 0 }
  0x12   : > { %p124_p8 = scmp.eq.s32.totalorder %s413_s17, 3  ;;  %p449_p9 = scmp.lt.s32.totalorder %s637_s15, 4 }
  0x13   : > { %p708_p10 = por %p118_p7, %p36_p0  ;;  %s717_s25 = sand.u32 1, %s633_s14  }
  0x14   : > { %p712_p11 = por %p124_p8, %p42_p3  ;;  %p719_p12 = pnand %p449_p9, %p38_p5 }
  0x15   : > { %s872_s23 = scalar_select %p708_p10, 1, 0 }
  0x16   : > { %s873_s24 = scalar_select %p712_p11, 1, 0 }
  0x17   : > { %s162_s27 = sand.u32 1, %s637_s15   ;;  %s418_s28 = sshll.u32 %s637_s15, 4 }
  0x18   : > { %s165_s29 = scalar_lea.vmem [#allocation5], %s717_s25  ;;  %s875_s1 = sld [smem:[#allocation13_spill]] }
  0x19   : > { %s172_s30 = sshll.u32 %s165_s29, 4  ;;  %s731_s7 = scalar_lea.sflag [#allocation6], %s162_s27  ;;  %s173_s30 = int_to_ptr.vmem [resolvable:$true] %s172_s30 }
  0x1a   : > { %p735_p0 = pneg %p719_p12 }
  0x1e   : > { %s170_s6 = scalar_lea.hbm %s875_s1, %s418_s28  ;;  %s490_s17 = scalar_lea.hbm %s875_s1, 64 }
  0x1f   : > { %s485_s8 = scalar_lea.hbm %s170_s6, 16  ;;  %p491_p3 = scmp.lt.s32.totalorder %s170_s6, %s875_s1 }
  0x20   : > { %p486_p13 = scmp.ne.s32.totalorder %s170_s6, %s485_s8  ;;  %p492_p4 = scmp.lt.s32.totalorder %s490_s17, %s485_s8 }
  0x22   : > { %p488_p1 = pnand %p735_p0, %p486_p13  ;;  %p493_p5 = por %p492_p4, %p491_p3 }
  0x24   : > { %p489_p2 = pneg %p488_p1 }
  0x26   : > { %p494_p7 = pnand %p493_p5, %p489_p2 }
  0x28   : > { %497 = shalt.err (!%p494_p7)
}
  0x29   : > { %s498_s27 = scalar_lea.vmem %s173_s30, 16  ;;  %s639_s29 = smov [#allocation5]  }
  0x2a   : > { %p499_p8 = scmp.ne.s32.totalorder %s173_s30, %s498_s27  ;;  %s503_s4 = sshll.u32 %s639_s29, 4  ;;  %s504_s4 = int_to_ptr.vmem [resolvable:$false] %s503_s4 }
  0x2b   : > { %s505_s5 = scalar_lea.vmem %s504_s4, 32  ;;  %p506_p13 = scmp.lt.s32.totalorder %s173_s30, %s504_s4 }
  0x2c   : > { %p501_p9 = pnand %p499_p8, %p735_p0  ;;  %p507_p1 = scmp.lt.s32.totalorder %s505_s5, %s498_s27 }
  0x2e   : > { %p502_p11 = pneg %p501_p9  ;;  %p508_p10 = por %p507_p1, %p506_p13 }
  0x30   : > { %p509_p6 = pnand %p508_p10, %p502_p11 }
  0x32   : > { %512 = shalt.err (!%p509_p6)
}
  0x33   : > { %441 = dma.hbm_to_vmem [thread:$0]  (!%p719_p12), %s170_s6, 16, %s173_s30, %s731_s7  }
  0x34   : > { %s757_s11 = scalar_lea.hbm %s865_s2, %s418_s28  ;;  %p420_p2 = scmp.ge.s32.totalorder %s637_s15, 1 }
  0x35   : > { %p194_p10 = scmp.lt.s32.totalorder %s637_s15, 5  ;;  %s416_s17 = sshll.u32 %s717_s25, 3 }
  0x36   : > { %s417_s19 = sshll.u32 %s637_s15, 7  ;;  %s148_s30 = scalar_lea.vmem [#allocation2], %s416_s17 }
  0x37   : > { %p763_p6 = pnand %p420_p2, %p194_p10  ;;  %s770_s4 = scalar_lea.hbm %s863_s0, %s417_s19 }
  0x38   : > { %s155_s6 = sshll.u32 %s148_s30, 4  ;;  %s145_s28 = scalar_lea.sflag [#allocation3], %s717_s25  ;;  %s156_s6 = int_to_ptr.vmem [resolvable:$true] %s155_s6 }
  0x39   : > { %s877_s20 = scalar_select %p763_p6, 1, 0 }
  0x3a   : > { %s513_s5 = scalar_lea.hbm %s770_s4, 128  ;;  %s518_s1 = scalar_lea.hbm %s863_s0, 512 }
  0x3b   : > { %p514_p11 = scmp.ne.s32.totalorder %s770_s4, %s513_s5  ;;  %p519_p5 = scmp.lt.s32.totalorder %s770_s4, %s863_s0 }
  0x3c   : > { %p520_p7 = scmp.lt.s32.totalorder %s518_s1, %s513_s5 }
  0x3d   : > { %p516_p3 = pnand %p514_p11, %p735_p0 }
  0x3e   : > { %p521_p8 = por %p520_p7, %p519_p5 }
  0x3f   : > { %p517_p4 = pneg %p516_p3 }
  0x41   : > { %p522_p9 = pnand %p521_p8, %p517_p4 }
  0x43   : > { %525 = shalt.err (!%p522_p9)
}
  0x44   : > { %s526_s17 = scalar_lea.vmem %s156_s6, 128  ;;  %s640_s19 = smov [#allocation2]  }
  0x45   : > { %p527_p13 = scmp.ne.s32.totalorder %s156_s6, %s526_s17  ;;  %s531_s29 = sshll.u32 %s640_s19, 4  ;;  %s532_s29 = int_to_ptr.vmem [resolvable:$false] %s531_s29 }
  0x46   : > { %s533_s30 = scalar_lea.vmem %s532_s29, 256  ;;  %p534_p10 = scmp.lt.s32.totalorder %s156_s6, %s532_s29 }
  0x47   : > { %p529_p1 = pnand %p527_p13, %p735_p0  ;;  %p535_p11 = scmp.lt.s32.totalorder %s533_s30, %s526_s17 }
  0x49   : > { %p530_p2 = pneg %p529_p1  ;;  %p536_p3 = por %p535_p11, %p534_p10 }
  0x4b   : > { %p537_p6 = pnand %p536_p3, %p530_p2 }
  0x4d   : > { %540 = shalt.err (!%p537_p6)
}
  0x4e   : > { %438 = dma.hbm_to_vmem [thread:$0]  (!%p719_p12), %s770_s4, 128, %s156_s6, %s145_s28  }
  0x4f   : > { %s182_s1 = scalar_lea.vmem [#allocation7], %s717_s25  ;;  %s541_s5 = scalar_lea.hbm %s757_s11, 16 }
  0x50   : > { %s189_s21 = sshll.u32 %s182_s1, 4  ;;  %p542_p4 = scmp.ne.s32.totalorder %s757_s11, %s541_s5  ;;  %s190_s21 = int_to_ptr.vmem [resolvable:$true] %s189_s21 }
  0x51   : > { %s546_s27 = scalar_lea.hbm %s865_s2, 64  ;;  %p547_p6 = scmp.lt.s32.totalorder %s757_s11, %s865_s2 }
  0x52   : > { %p544_p5 = pnand %p542_p4, %p735_p0  ;;  %p548_p8 = scmp.lt.s32.totalorder %s546_s27, %s541_s5 }
  0x54   : > { %p545_p7 = pneg %p544_p5  ;;  %p549_p9 = por %p548_p8, %p547_p6 }
  0x56   : > { %p550_p13 = pnand %p549_p9, %p545_p7 }
  0x58   : > { %553 = shalt.err (!%p550_p13)
}
  0x59   : > { %s554_s25 = scalar_lea.vmem %s190_s21, 16  ;;  %s641_s4 = smov [#allocation7]  }
  0x5a   : > { %p555_p1 = scmp.ne.s32.totalorder %s190_s21, %s554_s25  ;;  %s559_s6 = sshll.u32 %s641_s4, 4  ;;  %s560_s6 = int_to_ptr.vmem [resolvable:$false] %s559_s6 }
  0x5b   : > { %s561_s28 = scalar_lea.vmem %s560_s6, 32  ;;  %p562_p11 = scmp.lt.s32.totalorder %s190_s21, %s560_s6 }
  0x5c   : > { %p557_p2 = pnand %p555_p1, %p735_p0  ;;  %p563_p3 = scmp.lt.s32.totalorder %s561_s28, %s554_s25 }
  0x5e   : > { %p558_p10 = pneg %p557_p2  ;;  %p564_p4 = por %p563_p3, %p562_p11 }
  0x60   : > { %p565_p5 = pnand %p564_p4, %p558_p10 }
  0x62   : > { %568 = shalt.err (!%p565_p5)
}
  0x63   : > { %444 = dma.hbm_to_vmem [thread:$0]  (!%p719_p12), %s757_s11, 16, %s190_s21, %s731_s7  }
  0x64   : > { %p878_p7 = scmp.ne.s32.totalorder %s877_s20, 0 }
  0x65   : > { %s810_s9 = sand.u32 (!%p878_p7), 1, %s629_s13   ;;  %p879_p0 = scmp.ne.s32.totalorder (!%p878_p7), %s871_s22, 0 }
  0x66   : > { %198 = sbr.rel (%p878_p7) target bundleno = 185 (0xb9), region = 32  ;;  %s421_s29 = sshll.u32 (!%p878_p7), %s810_s9, 3 }
  0x67   : > { %s201_s30 = scalar_lea.sflag (!%p878_p7), [#allocation3], %s810_s9  ;;  %s204_s1 = scalar_lea.vmem (!%p878_p7), [#allocation2], %s421_s29 }
  0x6b   : > { %612 = dma.done.wait (%p879_p0), %s201_s30, 128  }
  0x6c   : > { %614 = vsyncadd (%p879_p0), %s201_s30, 4294967168  ;;  %s209_s26 = sand.u32 1, %s684_s16   ;;  %s212_s11 = scalar_lea.vmem [#allocation5], %s810_s9 }
  0x6d   : > { %s210_s7 = scalar_lea.sflag [#allocation6], %s209_s26 }
  0x6e   : > { %616 = dma.done.wait (%p879_p0), %s210_s7, 32  }
  0x6f   : > { %618 = vsyncadd (%p879_p0), %s210_s7, 4294967264  ;;  %v251_v0 = vld [vmem:[%s204_s1] sm:$0xff]  ;;  %v277_v18 = vlaneseq  ;;  %s220_s22 = scalar_lea.vmem [#allocation7], %s810_s9  ;;  %s250_s20 = scalar_lea.vmem [#allocation8], %s421_s29 }
  0x70   : > { %v252_v1 = vrot.slane %v251_v0, 4  ;;  %v269_v20 = vld [vmem:[%s212_s11] sm:$0x1]  ;;  %s306_s21 = sshll.u32 %s250_s20, 4  ;;  %s424_s5 = sshll.u32 %s684_s16, 7  ;;  %s307_s21 = int_to_ptr.vmem [resolvable:$true] %s306_s21 }
  0x71   : > { %v278_v19 = vshrl.u32 %v277_v18, 7  ;;  %v273_v24 = vld [vmem:[%s220_s22] sm:$0x1]  ;;  %s304_s27 = scalar_lea.hbm %s866_s3, %s424_s5  ;;  %s293_s17 = scalar_lea.sflag [#allocation4], %s810_s9 }
  0x72   : > { %v253_v2 = vadd.f32 %v252_v1, %v251_v0  ;;  %s569_s19 = scalar_lea.vmem %s307_s21, 128  ;;  %p880_p6 = scmp.ne.s32.totalorder %s872_s23, 0 }
  0x73   : > { %v279_v21 = vsub.s32 0, %v278_v19  ;;  %p570_p12 = scmp.ne.s32.totalorder %s307_s21, %s569_s19  ;;  %s642_s25 = smov [#allocation8]  }
  0x74   : > { %v254_v3 = vrot.slane %v253_v2, 2  ;;  %s573_s4 = sshll.u32 %s642_s25, 4  ;;  %s574_s4 = int_to_ptr.vmem [resolvable:$false] %s573_s4 }
  0x75   : > { %p571_p8 = pnand %p570_p12, %p880_p6  ;;  %s575_s6 = scalar_lea.vmem %s574_s4, 256 }
  0x76   : > { %v255_v4 = vadd.f32 %v254_v3, %v253_v2  ;;  %p576_p13 = scmp.lt.s32.totalorder %s307_s21, %s574_s4  ;;  %p577_p1 = scmp.lt.s32.totalorder %s575_s6, %s569_s19 }
  0x77   : > { %p572_p9 = pneg %p571_p8 }
  0x78   : > { %v256_v5 = vrot.slane %v255_v4, 1  ;;  %p578_p2 = por %p577_p1, %p576_p13 }
  0x7a   : > { %v257_v6 = vadd.f32 %v256_v5, %v255_v4  ;;  %p579_p10 = pnand %p578_p2, %p572_p9 }
  0x7c   : > { %v259_v7 = vmul.f32 0.125, %v257_v6 }
  0x7e   : > { %v260_v8 = vsub.f32 %v251_v0, %v259_v7 }
  0x80   : > { %v261_v9 = vmul.f32 %v260_v8, %v260_v8 }
  0x82   : > { %v262_v10 = vrot.slane %v261_v9, 4 }
  0x84   : > { %v263_v11 = vadd.f32 %v262_v10, %v261_v9 }
  0x86   : > { %v264_v12 = vrot.slane %v263_v11, 2 }
  0x88   : > { %v265_v13 = vadd.f32 %v264_v12, %v263_v11 }
  0x8a   : > { %v266_v14 = vrot.slane %v265_v13, 1 }
  0x8c   : > { %v267_v15 = vadd.f32 %v266_v14, %v265_v13 }
  0x8e   : > { %v268_v16 = vmul.f32 0.125, %v267_v15 }
  0x90   : > { %v270_v17 = vadd.f32 1e-05, %v268_v16 }
  0x92   : > { %483 = vrsqrt.f32 %v270_v17 }
  0x9f   : > { %v484_v22 = vpop.eup %483 }
  0xa0   : > { %v272_v23 = vmul.f32 %v484_v22, %v269_v20 }
  0xa2   : > { %v274_v25 = vmul.f32 %v272_v23, %v259_v7  ;;  %v280_v26 = vrot.slane %v272_v23, %v279_v21 }
  0xa4   : > { %v275_v27 = vsub.f32 %v273_v24, %v274_v25  ;;  %v282_v28 = vmul.f32 %v280_v26, %v251_v0 }
  0xa6   : > { %v287_v29 = vrot.slane %v275_v27, %v279_v21 }
  0xa8   : > { %v289_v30 = vadd.f32 %v287_v29, %v282_v28 }
  0xaa   : > { %v290_v31 = vmax.f32 %v289_v30, 0.0 }
  0xac   : > { %291 = vst [vmem:[%s250_s20] sm:$0xff] %v290_v31 }
  0xad   : > { %582 = shalt.err (!%p579_p10)
}
  0xae   : > { %s583_s16 = scalar_lea.hbm %s304_s27, 128  ;;  %s587_s29 = scalar_lea.hbm %s866_s3, 512 }
  0xaf   : > { %p584_p11 = scmp.ne.s32.totalorder %s304_s27, %s583_s16  ;;  %p588_p5 = scmp.lt.s32.totalorder %s304_s27, %s866_s3 }
  0xb0   : > { %p589_p7 = scmp.lt.s32.totalorder %s587_s29, %s583_s16 }
  0xb1   : > { %p585_p3 = pnand %p584_p11, %p880_p6 }
  0xb2   : > { %p590_p0 = por %p589_p7, %p588_p5 }
  0xb3   : > { %p586_p4 = pneg %p585_p3 }
  0xb5   : > { %p591_p12 = pnand %p590_p0, %p586_p4 }
  0xb7   : > { %594 = shalt.err (!%p591_p12)
}
  0xb8   : > { %433 = dma.vmem_to_hbm [thread:$0]  (%p880_p6), %s307_s21, 128, %s304_s27, %s293_s17  }
  0xb9 PF: > { %p450_p8 = scmp.ge.s32.totalorder %s637_s15, 2  ;;  %s318_s26 = sand.u32 1, %s625_s12  }
  0xba   : > { %p881_p9 = scmp.ne.s32.totalorder %s873_s24, 0  ;;  %s319_s7 = scalar_lea.sflag [#allocation4], %s318_s26 }
  0xbc   : > { %p446_p13 = pnand %p450_p8, %p881_p9 }
  0xbe   : > { %p447_p1 = pneg %p446_p13 }
  0xc0   : > { %620 = dma.done.wait (%p447_p1), %s319_s7, 128  }
  0xc1   : > { %622 = vsyncadd (%p447_p1), %s319_s7, 4294967168  ;;  %s882_s11 = sld [smem:[#allocation12_spill]]  ;;  %p19_p2 = scmp.ge.s32.totalorder %s688_s18, 6  }
  0xc2   : > { %s883_s12 = smov %s629_s13  ;;  %s884_s13 = smov %s633_s14 }
  0xc3   : > { %s886_s15 = smov %s688_s18  ;;  %21 = sbr.rel (!%p19_p2) target bundleno = 9 (0x9), region = 101 }
  0xc7   : > { %s885_s14 = smov %s882_s11 }
  0xc8   :  { %324 = vsyncpa [#allocation3], 1 }
  0xc9   :  { %326 = vsyncpa [#allocation3 + $0x1], 1 }
  0xca   :  { %327 = vsyncpa [#allocation6], 1 }
  0xcb   :  { %329 = vsyncpa [#allocation6 + $0x1], 1 }
  0xcc   :  { %330 = vsyncpa [#allocation4], 1 }
  0xcd   :  { %332 = vsyncpa [#allocation4 + $0x1], 1 }

</bundles_post_ra>
